<compile_context>
chip_gen: v7x
topology: tpu7x:2x2x1
jax: 0.10.0
libtpu: 0.0.40
codegen_flags: <defaults>
</compile_context>

<pallas_src>
import jax
import jax.numpy as jnp
from jax.experimental import pallas as pl
from jax.experimental.pallas import tpu as pltpu


def _round_up(x, m):
    return (x + m - 1) // m * m


def _choose_tiles(M, K, E, in_bytes, out_bytes, tm_target=1024,
                  vmem_budget=24 * 2 ** 20):
    """Pick (tm, m_pad, te, e_pad, vmem_footprint_bytes)."""

    def footprint(tm, te):
        # Double-buffered pipeline footprint of all operands.
        return (2 * tm * K * in_bytes        # patches tile
                + 2 * K * te * in_bytes      # weight tile (resident, still 2 bufs)
                + 2 * te * 4                 # bias tile (f32)
                + 2 * tm * te * out_bytes)   # output tile

    # --- tm: multiple of 16 (bf16 sublane packing); prefer a divisor of M so the
    #     patches array needs no HBM pad copy. ---
    if M <= tm_target:
        tm = _round_up(M, 16)
    else:
        tm = tm_target
        for cand in range(tm_target, 15, -16):
            if M % cand == 0:
                tm = cand
                break

    # --- te: prefer covering all of E (single streaming pass over patches);
    #     otherwise fall back to large 256-multiples and pad E up to a multiple. ---
    full = _round_up(E, 128)
    te_candidates = [full] + [t for t in (1024, 768, 512, 256, 128) if t < full]
    te = te_candidates[-1]
    for cand in te_candidates:
        if footprint(tm, cand) <= vmem_budget:
            te = cand
            break

    m_pad = _round_up(M, tm)
    e_pad = _round_up(E, te)
    return tm, m_pad, te, e_pad, footprint(tm, te)


def _patch_embed_kernel(x_ref, w_ref, b_ref, o_ref):
    # x_ref: (TM, K) patches, w_ref: (K, TE) weight, b_ref: (1, TE) f32 bias,
    # o_ref: (TM, TE).  K is un-tiled -> single MXU matmul, no accumulator needed.
    acc = jnp.dot(x_ref[...], w_ref[...], preferred_element_type=jnp.float32)
    o_ref[...] = (acc + b_ref[...]).astype(o_ref.dtype)


def patch_embed(x, weight, bias, kernel_size=(16, 16), stride=(16, 16),
                compute_dtype=jnp.bfloat16, out_dtype=None, tm_target=1024):
    """x: (B, C, H, W) NCHW; weight: (E, C, kh, kw); bias: (E,).

    Returns (B, Hp, Wp, E) — identical to PatchEmbed.forward (conv + permute(0,2,3,1)).
    Default path uses bf16 MXU inputs with f32 accumulation and emits bf16; pass
    compute_dtype=jnp.float32 (and/or out_dtype=jnp.float32) for f32 parity.
    """
    assert kernel_size == stride, "PatchEmbed assumes non-overlapping patches"
    B, C, H, W = x.shape
    kh, kw = kernel_size
    assert H % kh == 0 and W % kw == 0
    E = weight.shape[0]
    Hp, Wp = H // kh, W // kw
    M = B * Hp * Wp
    K = C * kh * kw
    out_dtype = compute_dtype if out_dtype is None else out_dtype

    # ---- Patchify: (B,C,Hp,kh,Wp,kw) -> (B,Hp,Wp,C,kh,kw) -> (M, K) ----
    # allow_input_fusion below lets XLA fuse this chain into the input DMA.
    patches = x.reshape(B, C, Hp, kh, Wp, kw)
    patches = jnp.transpose(patches, (0, 2, 4, 1, 3, 5)).reshape(M, K)
    patches = patches.astype(compute_dtype)

    # ---- Conv weight -> matmul weight (same (C,kh,kw) flatten order as Conv2d) ----
    w_mat = weight.reshape(E, K).T.astype(compute_dtype)       # (K, E)
    b_mat = bias.reshape(1, E).astype(jnp.float32)             # (1, E)

    in_bytes = jnp.dtype(compute_dtype).itemsize
    out_bytes = jnp.dtype(out_dtype).itemsize
    tm, m_pad, te, e_pad, fp = _choose_tiles(M, K, E, in_bytes, out_bytes, tm_target)

    if m_pad != M:
        patches = jnp.pad(patches, ((0, m_pad - M), (0, 0)))
    if e_pad != E:
        w_mat = jnp.pad(w_mat, ((0, 0), (0, e_pad - E)))
        b_mat = jnp.pad(b_mat, ((0, 0), (0, e_pad - E)))

    # E outer (usually a single tile -> patches streamed once), M inner -> the
    # (K, te) weight tile stays resident in VMEM across all M tiles.
    grid = (e_pad // te, m_pad // tm)

    vmem_limit = int(min(64 * 2 ** 20, max(32 * 2 ** 20, 2 * fp)))

    out = pl.pallas_call(
        _patch_embed_kernel,
        out_shape=jax.ShapeDtypeStruct((m_pad, e_pad), out_dtype),
        grid=grid,
        in_specs=[
            pl.BlockSpec((tm, K), lambda j, i: (i, 0)),     # patches: varies with M only
            pl.BlockSpec((K, te), lambda j, i: (0, j)),     # weight: varies with E only (resident over M)
            pl.BlockSpec((1, te), lambda j, i: (0, j)),     # bias:   varies with E only
        ],
        out_specs=pl.BlockSpec((tm, te), lambda j, i: (i, j)),
        compiler_params=pltpu.CompilerParams(
            dimension_semantics=("parallel", "parallel"),   # v7x megacore shards M
            allow_input_fusion=[True, False, False],        # fuse patchify into input DMA
            vmem_limit_bytes=vmem_limit,
        ),
    )(patches, w_mat, b_mat)

    return out[:M, :E].reshape(B, Hp, Wp, E)


if __name__ == "__main__":
    # Small, module-consistent shapes: B=2, in_chans=4, 16x16 images,
    # patch (kernel=stride) = 4x4, embed_dim=32  ->  output (2, 4, 4, 32).
    key = jax.random.PRNGKey(0)
    k_x, k_w, k_b = jax.random.split(key, 3)

    B, C, H, W = 2, 4, 16, 16
    kh, kw = 4, 4
    E = 32

    x = jax.random.normal(k_x, (B, C, H, W), dtype=jnp.float32)
    weight = jax.random.normal(k_w, (E, C, kh, kw), dtype=jnp.float32) * 0.02
    bias = jax.random.normal(k_b, (E,), dtype=jnp.float32) * 0.02

    out = patch_embed(x, weight, bias, kernel_size=(kh, kw), stride=(kh, kw))
    out = jax.block_until_ready(out)

    # Cross-check against XLA conv (same semantics as nn.Conv2d + permute(0,2,3,1)).
    ref = jax.lax.conv_general_dilated(
        x, weight, window_strides=(kh, kw), padding="VALID",
        dimension_numbers=("NCHW", "OIHW", "NCHW"))
    ref = jnp.transpose(ref + bias[None, :, None, None], (0, 2, 3, 1))
    assert out.shape == (B, H // kh, W // kw, E)
    # bf16 inputs/output with f32 accumulation -> loosened tolerance vs f32 reference.
    assert jnp.allclose(out.astype(jnp.float32), ref, atol=2e-2, rtol=2e-2)

    print("KERNEL_OK")
</pallas_src>

<mosaic_0001>
module attributes {stable_mosaic.version = 11 : i64} {
  func.func @_patch_embed_kernel(%arg0: i32, %arg1: i32, %arg2: memref<32x64xbf16, #tpu.memory_space<vmem>>, %arg3: memref<64x128xbf16, #tpu.memory_space<vmem>>, %arg4: memref<1x128xf32, #tpu.memory_space<vmem>>, %arg5: memref<32x128xbf16, #tpu.memory_space<vmem>>) attributes {dimension_semantics = [#tpu.dimension_semantics<parallel>, #tpu.dimension_semantics<parallel>], iteration_bounds = array<i64: 1, 1>, scalar_prefetch = 0 : i64, scratch_operands = 0 : i64, tpu.core_type = #tpu.core_type<tc>, window_params = [{transform_indices = @transform_0, window_bounds = array<i64: 32, 64>}, {transform_indices = @transform_1, window_bounds = array<i64: 64, 128>}, {transform_indices = @transform_2, window_bounds = array<i64: 1, 128>}, {transform_indices = @transform_3, window_bounds = array<i64: 32, 128>}]} {
    %c0 = arith.constant 0 : index
    %c0_0 = arith.constant 0 : index
    %0 = vector.load %arg2[%c0, %c0_0] : memref<32x64xbf16, #tpu.memory_space<vmem>>, vector<32x64xbf16>
    %c0_1 = arith.constant 0 : index
    %c0_2 = arith.constant 0 : index
    %1 = vector.load %arg3[%c0_1, %c0_2] : memref<64x128xbf16, #tpu.memory_space<vmem>>, vector<64x128xbf16>
    %cst = arith.constant dense<0.000000e+00> : vector<32x128xf32>
    %2 = tpu.matmul %0, %1, %cst {dimension_numbers = #tpu.dot_dimension_numbers<[1], [0], [0], [1], [0, 0, 1, 1], [], []>} : vector<32x64xbf16>, vector<64x128xbf16>, vector<32x128xf32> -> vector<32x128xf32>
    %c0_3 = arith.constant 0 : index
    %c0_4 = arith.constant 0 : index
    %3 = vector.load %arg4[%c0_3, %c0_4] : memref<1x128xf32, #tpu.memory_space<vmem>>, vector<1x128xf32>
    %4 = vector.broadcast %3 : vector<1x128xf32> to vector<32x128xf32>
    %5 = arith.addf %2, %4 : vector<32x128xf32>
    %6 = arith.truncf %5 : vector<32x128xf32> to vector<32x128xbf16>
    %c0_5 = arith.constant 0 : index
    %c0_6 = arith.constant 0 : index
    %7 = vector.load %arg5[%c0_5, %c0_6] : memref<32x128xbf16, #tpu.memory_space<vmem>>, vector<32x128xbf16>
    tpu.vector_store %arg5[%c0_5, %c0_6], %6 {strides = array<i32>} : memref<32x128xbf16, #tpu.memory_space<vmem>>, vector<32x128xbf16>,
    return
  }
  func.func @transform_0(%arg0: i32, %arg1: i32) -> (i32, i32) {
    %c0_i32 = arith.constant 0 : i32
    %c0_i32_0 = arith.constant 0 : i32
    return %arg1, %c0_i32 : i32, i32
  }
  func.func @transform_1(%arg0: i32, %arg1: i32) -> (i32, i32) {
    %c0_i32 = arith.constant 0 : i32
    %c0_i32_0 = arith.constant 0 : i32
    return %c0_i32, %arg0 : i32, i32
  }
  func.func @transform_2(%arg0: i32, %arg1: i32) -> (i32, i32) {
    %c0_i32 = arith.constant 0 : i32
    %c0_i32_0 = arith.constant 0 : i32
    return %c0_i32, %arg0 : i32, i32
  }
  func.func @transform_3(%arg0: i32, %arg1: i32) -> (i32, i32) {
    %c0_i32 = arith.constant 0 : i32
    return %arg1, %arg0 : i32, i32
  }
}

</mosaic_0001>

<bundles_post_ra>
// kernel: tpu_custom_call.1
= control target key start
LH: loop header
LB: loop body
LE: loop exit
PB: predicated region body
PF: predicated region fallthrough
CT: control target
= control target key end

     0   :  { %8 = vsyncpa [#allocation3], 0  ;;  %s393_s0 = inlined_call_operand.hbm [shape: bf16[32,64], index: 0, kind: input, shape index: {}]   ;;  %s394_s1 = inlined_call_operand.hbm [shape: bf16[64,128], index: 1, kind: input, shape index: {}]   ;;  %s395_s2 = inlined_call_operand.vmem [shape: f32[1,128], index: 2, kind: input, shape index: {}]   ;;  %s396_s3 = inlined_call_operand.hbm [shape: bf16[32,128], index: 3, kind: output, shape index: {}]  }
   0x1   :  { %9 = vsyncpa [#allocation6], 0 }
   0x2   :  { %10 = vsyncpa [#allocation4], 0  ;;  %s320_s12 = smov [#allocation2]   ;;  %s248_s16 = scalar_lea.hbm %s393_s0, 256 }
   0x3   :  { %s16_s13 = sshll.u32 %s320_s12, 4  ;;  %p249_p0 = scmp.ne.s32.totalorder %s393_s0, %s248_s16  ;;  %s17_s13 = int_to_ptr.vmem [resolvable:$true] %s16_s13 }
   0x4   :  { %p252_p1 = scmp.lt.u32.totalorder %s248_s16, %s393_s0 }
   0x6   :  { %p254_p2 = pnand %p252_p1, %p249_p0 }
   0x8   :  { %257 = shalt.err (!%p254_p2)
}
   0x9   :  { %s258_s21 = scalar_lea.vmem %s17_s13, 256  ;;  %p263_p4 = scmp.lt.s32.totalorder %s17_s13, %s17_s13 }
   0xa   :  { %p259_p3 = scmp.ne.s32.totalorder %s17_s13, %s258_s21  ;;  %p264_p5 = scmp.lt.s32.totalorder %s258_s21, %s258_s21 }
   0xc   :  { %p265_p6 = por %p264_p5, %p263_p4 }
   0xe   :  { %p266_p7 = pnand %p265_p6, %p259_p3 }
  0x10   :  { %269 = shalt.err (!%p266_p7)
}
  0x11   :  { %s321_s22 = smov 64   ;;  %s322_s23 = smov 4  }
  0x12   :  { %22 = dma.hbm_to_vmem [thread:$0]  %s393_s0, 256, %s17_s13, [#allocation3], %s321_s22, %s321_s22, %s322_s23  }
  0x13   :  { %s323_s26 = smov [#allocation5]   ;;  %s270_s30 = scalar_lea.hbm %s394_s1, 512 }
  0x14   :  { %s28_s27 = sshll.u32 %s323_s26, 4  ;;  %p271_p8 = scmp.ne.s32.totalorder %s394_s1, %s270_s30  ;;  %s29_s27 = int_to_ptr.vmem [resolvable:$true] %s28_s27 }
  0x15   :  { %p274_p9 = scmp.lt.u32.totalorder %s270_s30, %s394_s1 }
  0x17   :  { %p276_p10 = pnand %p274_p9, %p271_p8 }
  0x19   :  { %279 = shalt.err (!%p276_p10)
}
  0x1a   :  { %s280_s8 = scalar_lea.vmem %s29_s27, 512  ;;  %p285_p12 = scmp.lt.s32.totalorder %s29_s27, %s29_s27 }
  0x1b   :  { %p281_p11 = scmp.ne.s32.totalorder %s29_s27, %s280_s8  ;;  %p286_p13 = scmp.lt.s32.totalorder %s280_s8, %s280_s8 }
  0x1d   :  { %p287_p0 = por %p286_p13, %p285_p12 }
  0x1f   :  { %p288_p1 = pnand %p287_p0, %p281_p11 }
  0x21   :  { %291 = shalt.err (!%p288_p1)
}
  0x22   :  { %34 = dma.hbm_to_vmem [thread:$0]  %s394_s1, 512, %s29_s27, [#allocation6], %s321_s22, %s321_s22, %s322_s23  }
  0x23   :  { %314 = dma.done.wait [#allocation3], 256  }
  0x24   :  { %315 = vsyncadd [#allocation3], 4294967040 }
  0x25   :  { %316 = dma.done.wait [#allocation6], 512  }
  0x26   :  { %317 = vsyncadd [#allocation6], 4294966784  ;;  %v242_v0 = vld [vmem:[#allocation5] sm:$0xff]   ;;  %v243_v1 = vld [vmem:[#allocation5 + $0x8] sm:$0xff]   ;;  %vm97_vm0 = vcmask 523264   ;;  %s324_s11 = smov [#allocation7]  }
  0x27   :  { %225 = vmatprep.subr.bf16.mxu0 %v242_v0  ;;  %v244_v2 = vld [vmem:[#allocation5 + $0x10] sm:$0xff]   ;;  %v245_v4 = vld [vmem:[#allocation5 + $0x18] sm:$0xff]   ;;  %s178_s12 = sshll.u32 %s324_s11, 4  ;;  %s179_s12 = int_to_ptr.vmem [resolvable:$true] %s178_s12 }
  0x28   :  { %226 = vmatpush3.bf16.msra.mxu0 %v242_v0  ;;  %v246_v3 = vld [vmem:[#allocation2] sm:$0xff]   ;;  %v247_v5 = vld [vmem:[#allocation2 + $0x8] sm:$0xff]   ;;  %s292_s13 = scalar_lea.vmem %s179_s12, 256  ;;  %p297_p3 = scmp.lt.s32.totalorder %s179_s12, %s179_s12 }
  0x29   :  { %227 = vmatprep.subr.bf16.mxu0 %v243_v1  ;;  %233 = vmatprep.mubr.msk.bf16.mxu0 %vm97_vm0, %v246_v3  ;;  %v191_v7 = vld [vmem:[%s395_s2] ss:$0 sm:$0xff]  ;;  %p293_p2 = scmp.ne.s32.totalorder %s179_s12, %s292_s13  ;;  %p298_p4 = scmp.lt.s32.totalorder %s292_s13, %s292_s13 }
  0x2b   :  { %p299_p5 = por %p298_p4, %p297_p3 }
  0x2c   :  { %228 = vmatpush3.bf16.msra.mxu0 %v243_v1 }
  0x2d   :  { %229 = vmatprep.subr.bf16.mxu0 %v244_v2  ;;  %p300_p6 = pnand %p299_p5, %p293_p2 }
  0x30   :  { %230 = vmatpush3.bf16.msra.mxu0 %v244_v2 }
  0x31   :  { %231 = vmatprep.subr.bf16.mxu0 %v245_v4 }
  0x34   :  { %232 = vmatpush3.bf16.msra.mxu0 %v245_v4 }
  0x37   :  { %234 = vmatmul.mubr.msk.bf16.vlgmr.msra.gmra.mrb[0].mxu0 %vm97_vm0, %v247_v5 }
 0x10a   :  { %v235_v6 = vpop.f32.mrb[0].mxu0 }
 0x10b   :  { %v138_v8 = vpop.f32.mrb[1].mxu0  ;;  %v147_v10 = vadd.f32 %v235_v6, %v191_v7 }
 0x10c   :  { %v236_v9 = vpop.f32.mrb[2].mxu0  ;;  %v139_v13 = vadd.f32 %v191_v7, %v138_v8 }
 0x10d   :  { %v150_v11 = vadd.f32 %v236_v9, %v191_v7  ;;  %v141_v12 = vpop.f32.mrb[3].mxu0 }
 0x10e   :  { %v142_v14 = vadd.f32 %v191_v7, %v141_v12 }
 0x10f   :  { %v216_v15 = vpack.c.bf16 %v150_v11, %v147_v10 }
 0x110   :  { %v211_v16 = vpack.c.bf16 %v142_v14, %v139_v13 }
 0x111   :  { %218 = vst [vmem:[#allocation7 + $0x8] sm:$0xff] %v216_v15  }
 0x112   :  { %212 = vst [vmem:[#allocation7] sm:$0xff] %v211_v16  }
 0x113   :  { %303 = shalt.err (!%p300_p6)
}
 0x114   :  { %s304_s15 = scalar_lea.hbm %s396_s3, 256 }
 0x115   :  { %p305_p7 = scmp.ne.s32.totalorder %s396_s3, %s304_s15  ;;  %p308_p8 = scmp.lt.u32.totalorder %s304_s15, %s396_s3 }
 0x117   :  { %p310_p9 = pnand %p308_p8, %p305_p7 }
 0x119   :  { %313 = shalt.err (!%p310_p9)
}
 0x11a   :  { %184 = dma.vmem_to_hbm [thread:$0]  %s179_s12, 256, %s396_s3, [#allocation4], %s321_s22, %s321_s22, %s322_s23  }
 0x11b   :  { %318 = dma.done.wait [#allocation4], 256  }
 0x11c   :  { %319 = vsyncadd [#allocation4], 4294967040 }
 0x11d   :  { %188 = vsyncpa [#allocation3], 1 }
 0x11e   :  { %189 = vsyncpa [#allocation6], 1 }
 0x11f   :  { %190 = vsyncpa [#allocation4], 1 }

</bundles_post_ra>
